<compile_context>
chip_gen: v6e
topology: v6e:2x2x1
jax: 0.10.0
libtpu: 0.0.40
codegen_flags: <defaults>
</compile_context>

<pallas_src>
import functools

import jax
import jax.numpy as jnp
from jax.experimental import pallas as pl
from jax.experimental.pallas import tpu as pltpu


def _policy_kernel(x_ref, w1_ref, b1_ref, w2_ref, b2_ref, out_ref, *, discrete: bool):
    # hidden = relu(x @ W1 + b1)   (cast to f32 inside the kernel, mirrors .float())
    x = x_ref[...].astype(jnp.float32)
    h = jnp.dot(x, w1_ref[...], preferred_element_type=jnp.float32) + b1_ref[...]
    h = jnp.maximum(h, 0.0)

    # action_parameters = hidden @ W2 + b2
    out = jnp.dot(h, w2_ref[...], preferred_element_type=jnp.float32) + b2_ref[...]

    if discrete:
        m = jnp.max(out, axis=-1, keepdims=True)
        e = jnp.exp(out - m)
        out = e / jnp.sum(e, axis=-1, keepdims=True)   # exact; (TB,1) recip is negligible

    out_ref[...] = out.astype(out_ref.dtype)


def policy_forward(x, w1, b1, w2, b2, *, discrete: bool = False, tb: int = 1024):
    """Run PolicyNetwork.forward on TPU via a single fused, batch-tiled Pallas kernel."""
    B, OBS = x.shape
    HID = w1.shape[1]
    ACT = w2.shape[1]

    if B <= tb:
        # Single slab: one grid step, nothing to pipeline, skip the megacore split.
        TB = B
        grid = (1,)
        semantics = ("arbitrary",)
    else:
        TB = tb  # multiple of 8 by construction (tb default 1024)
        grid = (pl.cdiv(B, TB),)
        # Only shard across TensorCores if each core still gets >= 2 steps,
        # otherwise BlockSpec double-buffering has nothing to overlap.
        semantics = ("parallel",) if grid[0] >= 4 else ("arbitrary",)

    kernel = functools.partial(_policy_kernel, discrete=discrete)
    return pl.pallas_call(
        kernel,
        out_shape=jax.ShapeDtypeStruct((B, ACT), jnp.float32),
        grid=grid,
        in_specs=[
            pl.BlockSpec((TB, OBS), lambda i: (i, 0)),   # x: tiled over batch
            pl.BlockSpec((OBS, HID), lambda i: (0, 0)),  # W1: resident
            pl.BlockSpec((1, HID), lambda i: (0, 0)),    # b1: resident
            pl.BlockSpec((HID, ACT), lambda i: (0, 0)),  # W2: resident
            pl.BlockSpec((1, ACT), lambda i: (0, 0)),    # b2: resident
        ],
        out_specs=pl.BlockSpec((TB, ACT), lambda i: (i, 0)),  # last dim == full dim
        compiler_params=pltpu.CompilerParams(dimension_semantics=semantics),
    )(x, w1, b1, w2, b2)


def init_params(key, observation_space, hidden, actions):
    """Deterministic PyTorch-Linear-style init (uniform +-1/sqrt(fan_in))."""
    k1, k2, k3, k4 = jax.random.split(key, 4)
    lim1 = 1.0 / jnp.sqrt(observation_space)
    lim2 = 1.0 / jnp.sqrt(hidden)
    w1 = jax.random.uniform(k1, (observation_space, hidden), jnp.float32, -lim1, lim1)
    b1 = jax.random.uniform(k2, (1, hidden), jnp.float32, -lim1, lim1)
    w2 = jax.random.uniform(k3, (hidden, actions), jnp.float32, -lim2, lim2)
    b2 = jax.random.uniform(k4, (1, actions), jnp.float32, -lim2, lim2)
    return w1, b1, w2, b2


def _ref_forward(x, w1, b1, w2, b2, discrete):
    h = jnp.maximum(x @ w1 + b1, 0.0)
    out = h @ w2 + b2
    return jax.nn.softmax(out, axis=-1) if discrete else out


if __name__ == "__main__":
    # Module-consistent shapes: observation dim 16, hidden=64 (module default), actions=4.
    OBS, HID, ACT = 16, 64, 4
    key = jax.random.PRNGKey(0)
    kx, kp = jax.random.split(key)
    w1, b1, w2, b2 = init_params(kp, OBS, HID, ACT)

    # --- small batch: single-step path (grid=(1,)) ---
    B1 = 512
    x1 = jax.random.normal(kx, (B1, OBS), jnp.float32)
    out = jax.block_until_ready(policy_forward(x1, w1, b1, w2, b2, discrete=False))
    out_d = jax.block_until_ready(policy_forward(x1, w1, b1, w2, b2, discrete=True))
    ref = _ref_forward(x1, w1, b1, w2, b2, False)
    ref_d = _ref_forward(x1, w1, b1, w2, b2, True)
    assert out.shape == (B1, ACT) and out.dtype == jnp.float32
    assert jnp.allclose(out, ref, atol=1e-5, rtol=1e-5)
    assert jnp.allclose(out_d, ref_d, atol=1e-5, rtol=1e-5)

    # --- larger batch: batch-tiled, pipelined path (TB=1024, grid=(4,), parallel) ---
    B2 = 4096
    x2 = jax.random.normal(kx, (B2, OBS), jnp.float32)
    out2 = jax.block_until_ready(policy_forward(x2, w1, b1, w2, b2, discrete=True))
    ref2 = _ref_forward(x2, w1, b1, w2, b2, True)
    assert out2.shape == (B2, ACT)
    assert jnp.allclose(out2, ref2, atol=1e-5, rtol=1e-5)

    print("KERNEL_OK")
</pallas_src>

<mosaic_0001>
module attributes {stable_mosaic.version = 11 : i64} {
  func.func @_policy_kernel(%arg0: i32, %arg1: memref<512x16xf32, #tpu.memory_space<vmem>>, %arg2: memref<16x64xf32, #tpu.memory_space<vmem>>, %arg3: memref<1x64xf32, #tpu.memory_space<vmem>>, %arg4: memref<64x4xf32, #tpu.memory_space<vmem>>, %arg5: memref<1x4xf32, #tpu.memory_space<vmem>>, %arg6: memref<512x4xf32, #tpu.memory_space<vmem>>) attributes {dimension_semantics = [#tpu.dimension_semantics<arbitrary>], iteration_bounds = array<i64: 1>, scalar_prefetch = 0 : i64, scratch_operands = 0 : i64, tpu.core_type = #tpu.core_type<tc>, window_params = [{transform_indices = @transform_0, window_bounds = array<i64: 512, 16>}, {pipeline_mode = #tpu.pipeline_mode<synchronous>, transform_indices = @transform_1, window_bounds = array<i64: 16, 64>}, {pipeline_mode = #tpu.pipeline_mode<synchronous>, transform_indices = @transform_2, window_bounds = array<i64: 1, 64>}, {pipeline_mode = #tpu.pipeline_mode<synchronous>, transform_indices = @transform_3, window_bounds = array<i64: 64, 4>}, {pipeline_mode = #tpu.pipeline_mode<synchronous>, transform_indices = @transform_4, window_bounds = array<i64: 1, 4>}, {transform_indices = @transform_5, window_bounds = array<i64: 512, 4>}]} {
    %c0 = arith.constant 0 : index
    %c0_0 = arith.constant 0 : index
    %0 = vector.load %arg1[%c0, %c0_0] : memref<512x16xf32, #tpu.memory_space<vmem>>, vector<512x16xf32>
    %c0_1 = arith.constant 0 : index
    %c0_2 = arith.constant 0 : index
    %1 = vector.load %arg2[%c0_1, %c0_2] : memref<16x64xf32, #tpu.memory_space<vmem>>, vector<16x64xf32>
    %cst = arith.constant dense<0.000000e+00> : vector<512x64xf32>
    %2 = tpu.matmul %0, %1, %cst {dimension_numbers = #tpu.dot_dimension_numbers<[1], [0], [0], [1], [0, 0, 1, 1], [], []>} : vector<512x16xf32>, vector<16x64xf32>, vector<512x64xf32> -> vector<512x64xf32>
    %c0_3 = arith.constant 0 : index
    %c0_4 = arith.constant 0 : index
    %3 = vector.load %arg3[%c0_3, %c0_4] : memref<1x64xf32, #tpu.memory_space<vmem>>, vector<1x64xf32>
    %4 = vector.broadcast %3 : vector<1x64xf32> to vector<512x64xf32>
    %5 = arith.addf %2, %4 : vector<512x64xf32>
    %cst_5 = arith.constant 0.000000e+00 : f32
    %6 = vector.broadcast %cst_5 : f32 to vector<512x64xf32>
    %7 = arith.maximumf %5, %6 : vector<512x64xf32>
    %c0_6 = arith.constant 0 : index
    %c0_7 = arith.constant 0 : index
    %8 = vector.load %arg4[%c0_6, %c0_7] : memref<64x4xf32, #tpu.memory_space<vmem>>, vector<64x4xf32>
    %cst_8 = arith.constant dense<0.000000e+00> : vector<512x4xf32>
    %9 = tpu.matmul %7, %8, %cst_8 {dimension_numbers = #tpu.dot_dimension_numbers<[1], [0], [0], [1], [0, 0, 1, 1], [], []>} : vector<512x64xf32>, vector<64x4xf32>, vector<512x4xf32> -> vector<512x4xf32>
    %c0_9 = arith.constant 0 : index
    %c0_10 = arith.constant 0 : index
    %10 = vector.load %arg5[%c0_9, %c0_10] : memref<1x4xf32, #tpu.memory_space<vmem>>, vector<1x4xf32>
    %11 = vector.broadcast %10 : vector<1x4xf32> to vector<512x4xf32>
    %12 = arith.addf %9, %11 : vector<512x4xf32>
    %c0_11 = arith.constant 0 : index
    %c0_12 = arith.constant 0 : index
    %13 = vector.load %arg6[%c0_11, %c0_12] : memref<512x4xf32, #tpu.memory_space<vmem>>, vector<512x4xf32>
    tpu.vector_store %arg6[%c0_11, %c0_12], %12 {strides = array<i32>} : memref<512x4xf32, #tpu.memory_space<vmem>>, vector<512x4xf32>,
    return
  }
  func.func @transform_0(%arg0: i32) -> (i32, i32) {
    %c0_i32 = arith.constant 0 : i32
    %c0_i32_0 = arith.constant 0 : i32
    return %arg0, %c0_i32 : i32, i32
  }
  func.func @transform_1(%arg0: i32) -> (i32, i32) {
    %c0_i32 = arith.constant 0 : i32
    %c0_i32_0 = arith.constant 0 : i32
    %c0_i32_1 = arith.constant 0 : i32
    return %c0_i32, %c0_i32_0 : i32, i32
  }
  func.func @transform_2(%arg0: i32) -> (i32, i32) {
    %c0_i32 = arith.constant 0 : i32
    %c0_i32_0 = arith.constant 0 : i32
    %c0_i32_1 = arith.constant 0 : i32
    return %c0_i32, %c0_i32_0 : i32, i32
  }
  func.func @transform_3(%arg0: i32) -> (i32, i32) {
    %c0_i32 = arith.constant 0 : i32
    %c0_i32_0 = arith.constant 0 : i32
    %c0_i32_1 = arith.constant 0 : i32
    return %c0_i32, %c0_i32_0 : i32, i32
  }
  func.func @transform_4(%arg0: i32) -> (i32, i32) {
    %c0_i32 = arith.constant 0 : i32
    %c0_i32_0 = arith.constant 0 : i32
    %c0_i32_1 = arith.constant 0 : i32
    return %c0_i32, %c0_i32_0 : i32, i32
  }
  func.func @transform_5(%arg0: i32) -> (i32, i32) {
    %c0_i32 = arith.constant 0 : i32
    %c0_i32_0 = arith.constant 0 : i32
    return %arg0, %c0_i32 : i32, i32
  }
}

</mosaic_0001>

<bundles_post_ra>
// kernel: tpu_custom_call.1
= control target key start
LH: loop header
LB: loop body
LE: loop exit
PB: predicated region body
PF: predicated region fallthrough
CT: control target
= control target key end

     0   :  { %vm93_vm0 = vcmask 130048   ;;  %vm750_vm1 = vcmask 523264   ;;  %vm1328_vm2 = vcmask 31744   ;;  %s2667_s1 = inlined_call_operand.vmem [shape: f32[16,64], index: 1, kind: input, shape index: {}]   ;;  %s2668_s0 = inlined_call_operand.vmem [shape: f32[512,16], index: 0, kind: input, shape index: {}]   ;;  %s2669_s3 = inlined_call_operand.vmem [shape: f32[64,4], index: 3, kind: input, shape index: {}]   ;;  %s2670_s2 = inlined_call_operand.vmem [shape: f32[1,64], index: 2, kind: input, shape index: {}]   ;;  %s2671_s4 = inlined_call_operand.vmem [shape: f32[1,4], index: 4, kind: input, shape index: {}]   ;;  %s2672_s5 = inlined_call_operand.vmem [shape: f32[512,4], index: 5, kind: output, shape index: {}]  }
   0x1   :  { %v85_v0 = vld [vmem:[%s2667_s1 + $0x8] sm:$0xff]  ;;  %v84_v1 = vld [vmem:[%s2667_s1] sm:$0xff]  ;;  %v22_v4 = vld [vmem:[%s2668_s0 + $0x10] sm:$0xff] }
   0x2   :  { %v20_v2 = vld [vmem:[%s2668_s0] sm:$0xff]  ;;  %1665 = vmatprep.subr.mxu0 %v85_v0  ;;  %v21_v3 = vld [vmem:[%s2668_s0 + $0x8] sm:$0xff]  ;;  %v23_v5 = vld [vmem:[%s2668_s0 + $0x18] sm:$0xff] }
   0x3   :  { %1669 = vmatprep.mubr.msk.f32.mxu0 %vm93_vm0, %v20_v2  ;;  %1666 = vmatpush3.msra.mxu0 %v85_v0  ;;  %v24_v6 = vld [vmem:[%s2668_s0 + $0x20] sm:$0xff]  ;;  %v25_v7 = vld [vmem:[%s2668_s0 + $0x28] sm:$0xff]  ;;  %v26_v8 = vld [vmem:[%s2668_s0 + $0x30] sm:$0xff] }
   0x4   :  { %1667 = vmatprep.subr.mxu0 %v84_v1  ;;  %v27_v9 = vld [vmem:[%s2668_s0 + $0x38] sm:$0xff]  ;;  %v28_v10 = vld [vmem:[%s2668_s0 + $0x40] sm:$0xff]  ;;  %v29_v11 = vld [vmem:[%s2668_s0 + $0x48] sm:$0xff] }
   0x5   :  { %1668 = vmatpush3.msra.mxu0 %v84_v1  ;;  %v30_v12 = vld [vmem:[%s2668_s0 + $0x50] sm:$0xff]  ;;  %v31_v13 = vld [vmem:[%s2668_s0 + $0x58] sm:$0xff]  ;;  %v32_v16 = vld [vmem:[%s2668_s0 + $0x60] sm:$0xff] }
   0x6   :  { %1670 = vmatmul.mubr.msk.f32.vlgmr.msra.gmra.mxu0 %vm93_vm0, %v21_v3  ;;  %v742_v14 = vld [vmem:[%s2669_s3 + $0x38] sm:$0xff]  ;;  %v741_v15 = vld [vmem:[%s2669_s3 + $0x30] sm:$0xff]  ;;  %v740_v17 = vld [vmem:[%s2669_s3 + $0x28] sm:$0xff] }
   0x7   :  { %1672 = vmatprep.mubr.msk.f32.mxu0 %vm93_vm0, %v22_v4  ;;  %1765 = vmatprep.subr.mxu0 %v742_v14  ;;  %v33_v18 = vld [vmem:[%s2668_s0 + $0x68] sm:$0xff]  ;;  %v739_v19 = vld [vmem:[%s2669_s3 + $0x20] sm:$0xff]  ;;  %v34_v20 = vld [vmem:[%s2668_s0 + $0x70] sm:$0xff] }
   0x8   :  { %1877 = vmatprep.subr.mxu1 %v742_v14  ;;  %1766 = vmatpush3.msra.mxu0 %v742_v14  ;;  %v35_v21 = vld [vmem:[%s2668_s0 + $0x78] sm:$0xff]  ;;  %v36_v22 = vld [vmem:[%s2668_s0 + $0x80] sm:$0xff]  ;;  %v37_v23 = vld [vmem:[%s2668_s0 + $0x88] sm:$0xff] }
   0x9   :  { %1885 = vmatpush3.msra.mxu1 %v742_v14  ;;  %1767 = vmatprep.subr.mxu0 %v741_v15  ;;  %v38_v24 = vld [vmem:[%s2668_s0 + $0x90] sm:$0xff]  ;;  %v39_v25 = vld [vmem:[%s2668_s0 + $0x98] sm:$0xff]  ;;  %v40_v26 = vld [vmem:[%s2668_s0 + $0xa0] sm:$0xff] }
   0xa   :  { %1673 = vmatmul.mubr.msk.f32.gmra.mxu0 %vm93_vm0, %v23_v5  ;;  %1878 = vmatprep.subr.mxu1 %v741_v15  ;;  %v41_v27 = vld [vmem:[%s2668_s0 + $0xa8] sm:$0xff]  ;;  %v42_v28 = vld [vmem:[%s2668_s0 + $0xb0] sm:$0xff]  ;;  %v43_v29 = vld [vmem:[%s2668_s0 + $0xb8] sm:$0xff] }
   0xb   :  { %1675 = vmatprep.mubr.msk.f32.mxu0 %vm93_vm0, %v24_v6  ;;  %1768 = vmatpush3.msra.mxu0 %v741_v15  ;;  %v44_v30 = vld [vmem:[%s2668_s0 + $0xc0] sm:$0xff]  ;;  %v45_v31 = vld [vmem:[%s2668_s0 + $0xc8] sm:$0xff]  ;;  %v46_v32 = vld [vmem:[%s2668_s0 + $0xd0] sm:$0xff] }
   0xc   :  { %1769 = vmatprep.subr.mxu0 %v740_v17  ;;  %1886 = vmatpush3.msra.mxu1 %v741_v15  ;;  %v47_v33 = vld [vmem:[%s2668_s0 + $0xd8] sm:$0xff]  ;;  %v48_v34 = vld [vmem:[%s2668_s0 + $0xe0] sm:$0xff]  ;;  %v49_v35 = vld [vmem:[%s2668_s0 + $0xe8] sm:$0xff] }
   0xd   :  { %1770 = vmatpush3.msra.mxu0 %v740_v17  ;;  %1879 = vmatprep.subr.mxu1 %v740_v17  ;;  %v50_v36 = vld [vmem:[%s2668_s0 + $0xf0] sm:$0xff]  ;;  %v51_v37 = vld [vmem:[%s2668_s0 + $0xf8] sm:$0xff]  ;;  %v52_v38 = vld [vmem:[%s2668_s0 + $0x100] sm:$0xff] }
   0xe   :  { %1676 = vmatmul.mubr.msk.f32.gmra.mxu0 %vm93_vm0, %v25_v7  ;;  %1771 = vmatprep.subr.mxu0 %v739_v19  ;;  %v53_v39 = vld [vmem:[%s2668_s0 + $0x108] sm:$0xff]  ;;  %v54_v40 = vld [vmem:[%s2668_s0 + $0x110] sm:$0xff]  ;;  %v738_v41 = vld [vmem:[%s2669_s3 + $0x18] sm:$0xff] }
   0xf   :  { %1678 = vmatprep.mubr.msk.f32.mxu0 %vm93_vm0, %v26_v8  ;;  %1772 = vmatpush3.msra.mxu0 %v739_v19  ;;  %v55_v42 = vld [vmem:[%s2668_s0 + $0x118] sm:$0xff]  ;;  %v737_v43 = vld [vmem:[%s2669_s3 + $0x10] sm:$0xff]  ;;  %v56_v44 = vld [vmem:[%s2668_s0 + $0x120] sm:$0xff] }
  0x10   :  { %1887 = vmatpush3.msra.mxu1 %v740_v17  ;;  %1773 = vmatprep.subr.mxu0 %v738_v41  ;;  %v736_v45 = vld [vmem:[%s2669_s3 + $0x8] sm:$0xff]  ;;  %v735_v47 = vld [vmem:[%s2669_s3] sm:$0xff]  ;;  %v58_v48 = vld [vmem:[%s2668_s0 + $0x130] sm:$0xff] }
  0x11   :  { %1880 = vmatprep.subr.mxu1 %v739_v19  ;;  %1774 = vmatpush3.msra.mxu0 %v738_v41  ;;  %v57_v46 = vld [vmem:[%s2668_s0 + $0x128] sm:$0xff]  ;;  %v59_v49 = vld [vmem:[%s2668_s0 + $0x138] sm:$0xff]  ;;  %v60_v50 = vld [vmem:[%s2668_s0 + $0x140] sm:$0xff] }
  0x12   :  { %1679 = vmatmul.mubr.msk.f32.gmra.mxu0 %vm93_vm0, %v27_v9  ;;  %1888 = vmatpush3.msra.mxu1 %v739_v19  ;;  %v61_v51 = vld [vmem:[%s2668_s0 + $0x148] sm:$0xff]  ;;  %v62_v52 = vld [vmem:[%s2668_s0 + $0x150] sm:$0xff]  ;;  %v63_v53 = vld [vmem:[%s2668_s0 + $0x158] sm:$0xff] }
  0x13   :  { %1681 = vmatprep.mubr.msk.f32.mxu0 %vm93_vm0, %v28_v10  ;;  %1775 = vmatprep.subr.mxu0 %v737_v43  ;;  %v64_v54 = vld [vmem:[%s2668_s0 + $0x160] sm:$0xff]  ;;  %v65_v55 = vld [vmem:[%s2668_s0 + $0x168] sm:$0xff]  ;;  %v66_v56 = vld [vmem:[%s2668_s0 + $0x170] sm:$0xff] }
  0x14   :  { %1881 = vmatprep.subr.mxu1 %v738_v41  ;;  %1776 = vmatpush3.msra.mxu0 %v737_v43  ;;  %v67_v57 = vld [vmem:[%s2668_s0 + $0x178] sm:$0xff]  ;;  %v68_v58 = vld [vmem:[%s2668_s0 + $0x180] sm:$0xff]  ;;  %v69_v59 = vld [vmem:[%s2668_s0 + $0x188] sm:$0xff] }
  0x15   :  { %1889 = vmatpush3.msra.mxu1 %v738_v41  ;;  %1777 = vmatprep.subr.mxu0 %v736_v45  ;;  %v70_v60 = vld [vmem:[%s2668_s0 + $0x190] sm:$0xff]  ;;  %v71_v61 = vld [vmem:[%s2668_s0 + $0x198] sm:$0xff]  ;;  %v72_v62 = vld [vmem:[%s2668_s0 + $0x1a0] sm:$0xff] }
  0x16   :  { %1682 = vmatmul.mubr.msk.f32.gmra.mxu0 %vm93_vm0, %v29_v11  ;;  %1882 = vmatprep.subr.mxu1 %v737_v43  ;;  %v73_v63 = vld [vmem:[%s2668_s0 + $0x1a8] sm:$0xff]  ;;  %v74_v0 = vld [vmem:[%s2668_s0 + $0x1b0] sm:$0xff]  ;;  %v75_v1 = vld [vmem:[%s2668_s0 + $0x1b8] sm:$0xff] }
  0x17   :  { %1684 = vmatprep.mubr.msk.f32.mxu0 %vm93_vm0, %v30_v12  ;;  %1778 = vmatpush3.msra.mxu0 %v736_v45  ;;  %v76_v2 = vld [vmem:[%s2668_s0 + $0x1c0] sm:$0xff]  ;;  %v77_v3 = vld [vmem:[%s2668_s0 + $0x1c8] sm:$0xff]  ;;  %v78_v4 = vld [vmem:[%s2668_s0 + $0x1d0] sm:$0xff] }
  0x18   :  { %1779 = vmatprep.subr.mxu0 %v735_v47  ;;  %1890 = vmatpush3.msra.mxu1 %v737_v43  ;;  %v79_v5 = vld [vmem:[%s2668_s0 + $0x1d8] sm:$0xff]  ;;  %v80_v6 = vld [vmem:[%s2668_s0 + $0x1e0] sm:$0xff]  ;;  %v81_v7 = vld [vmem:[%s2668_s0 + $0x1e8] sm:$0xff] }
  0x19   :  { %1780 = vmatpush3.msra.mxu0 %v735_v47  ;;  %1883 = vmatprep.subr.mxu1 %v736_v45  ;;  %v82_v8 = vld [vmem:[%s2668_s0 + $0x1f0] sm:$0xff]  ;;  %v83_v9 = vld [vmem:[%s2668_s0 + $0x1f8] sm:$0xff]  ;;  %v2212_v10 = vld [vmem:[%s2670_s2] ss:$0 sm:$0xff] }
  0x1a   :  { %1685 = vmatmul.mubr.msk.f32.gmra.mxu0 %vm93_vm0, %v31_v13  ;;  %1891 = vmatpush3.msra.mxu1 %v736_v45 }
  0x1b   :  { %1687 = vmatprep.mubr.msk.f32.mxu0 %vm93_vm0, %v32_v16  ;;  %1884 = vmatprep.subr.mxu1 %v735_v47 }
  0x1c   :  { %1892 = vmatpush3.msra.mxu1 %v735_v47 }
  0x1e   :  { %1688 = vmatmul.mubr.msk.f32.gmra.mxu0 %vm93_vm0, %v33_v18 }
  0x1f   :  { %1690 = vmatprep.mubr.msk.f32.mxu0 %vm93_vm0, %v34_v20 }
  0x22   :  { %1691 = vmatmul.mubr.msk.f32.gmra.mxu0 %vm93_vm0, %v35_v21 }
  0x23   :  { %1693 = vmatprep.mubr.msk.f32.mxu0 %vm93_vm0, %v36_v22 }
  0x26   :  { %1694 = vmatmul.mubr.msk.f32.gmra.mxu0 %vm93_vm0, %v37_v23 }
  0x27   :  { %1696 = vmatprep.mubr.msk.f32.mxu0 %vm93_vm0, %v38_v24 }
  0x2a   :  { %1697 = vmatmul.mubr.msk.f32.gmra.mxu0 %vm93_vm0, %v39_v25 }
  0x2b   :  { %1699 = vmatprep.mubr.msk.f32.mxu0 %vm93_vm0, %v40_v26 }
  0x2e   :  { %1700 = vmatmul.mubr.msk.f32.gmra.mxu0 %vm93_vm0, %v41_v27 }
  0x2f   :  { %1702 = vmatprep.mubr.msk.f32.mxu0 %vm93_vm0, %v42_v28 }
  0x32   :  { %1703 = vmatmul.mubr.msk.f32.gmra.mxu0 %vm93_vm0, %v43_v29 }
  0x33   :  { %1705 = vmatprep.mubr.msk.f32.mxu0 %vm93_vm0, %v44_v30 }
  0x36   :  { %1706 = vmatmul.mubr.msk.f32.gmra.mxu0 %vm93_vm0, %v45_v31 }
  0x37   :  { %1708 = vmatprep.mubr.msk.f32.mxu0 %vm93_vm0, %v46_v32 }
  0x3a   :  { %1709 = vmatmul.mubr.msk.f32.gmra.mxu0 %vm93_vm0, %v47_v33 }
  0x3b   :  { %1711 = vmatprep.mubr.msk.f32.mxu0 %vm93_vm0, %v48_v34 }
  0x3e   :  { %1712 = vmatmul.mubr.msk.f32.gmra.mxu0 %vm93_vm0, %v49_v35 }
  0x3f   :  { %1714 = vmatprep.mubr.msk.f32.mxu0 %vm93_vm0, %v50_v36 }
  0x42   :  { %1715 = vmatmul.mubr.msk.f32.gmra.mxu0 %vm93_vm0, %v51_v37 }
  0x43   :  { %1717 = vmatprep.mubr.msk.f32.mxu0 %vm93_vm0, %v52_v38 }
  0x46   :  { %1718 = vmatmul.mubr.msk.f32.gmra.mxu0 %vm93_vm0, %v53_v39 }
  0x47   :  { %1720 = vmatprep.mubr.msk.f32.mxu0 %vm93_vm0, %v54_v40 }
  0x4a   :  { %1721 = vmatmul.mubr.msk.f32.gmra.mxu0 %vm93_vm0, %v55_v42 }
  0x4b   :  { %1723 = vmatprep.mubr.msk.f32.mxu0 %vm93_vm0, %v56_v44 }
  0x4e   :  { %1724 = vmatmul.mubr.msk.f32.gmra.mxu0 %vm93_vm0, %v57_v46 }
  0x4f   :  { %1726 = vmatprep.mubr.msk.f32.mxu0 %vm93_vm0, %v58_v48 }
  0x52   :  { %1727 = vmatmul.mubr.msk.f32.gmra.mxu0 %vm93_vm0, %v59_v49 }
  0x53   :  { %1729 = vmatprep.mubr.msk.f32.mxu0 %vm93_vm0, %v60_v50 }
  0x56   :  { %1730 = vmatmul.mubr.msk.f32.gmra.mxu0 %vm93_vm0, %v61_v51 }
  0x57   :  { %1732 = vmatprep.mubr.msk.f32.mxu0 %vm93_vm0, %v62_v52 }
  0x5a   :  { %1733 = vmatmul.mubr.msk.f32.gmra.mxu0 %vm93_vm0, %v63_v53 }
  0x5b   :  { %1735 = vmatprep.mubr.msk.f32.mxu0 %vm93_vm0, %v64_v54 }
  0x5e   :  { %1736 = vmatmul.mubr.msk.f32.gmra.mxu0 %vm93_vm0, %v65_v55 }
  0x5f   :  { %1738 = vmatprep.mubr.msk.f32.mxu0 %vm93_vm0, %v66_v56 }
  0x62   :  { %1739 = vmatmul.mubr.msk.f32.gmra.mxu0 %vm93_vm0, %v67_v57 }
  0x63   :  { %1741 = vmatprep.mubr.msk.f32.mxu0 %vm93_vm0, %v68_v58 }
  0x66   :  { %1742 = vmatmul.mubr.msk.f32.gmra.mxu0 %vm93_vm0, %v69_v59 }
  0x67   :  { %1744 = vmatprep.mubr.msk.f32.mxu0 %vm93_vm0, %v70_v60 }
  0x6a   :  { %1745 = vmatmul.mubr.msk.f32.gmra.mxu0 %vm93_vm0, %v71_v61 }
  0x6b   :  { %1747 = vmatprep.mubr.msk.f32.mxu0 %vm93_vm0, %v72_v62 }
  0x6e   :  { %1748 = vmatmul.mubr.msk.f32.gmra.mxu0 %vm93_vm0, %v73_v63 }
  0x6f   :  { %1750 = vmatprep.mubr.msk.f32.mxu0 %vm93_vm0, %v74_v0 }
  0x72   :  { %1751 = vmatmul.mubr.msk.f32.gmra.mxu0 %vm93_vm0, %v75_v1 }
  0x73   :  { %1753 = vmatprep.mubr.msk.f32.mxu0 %vm93_vm0, %v76_v2 }
  0x76   :  { %1754 = vmatmul.mubr.msk.f32.gmra.mxu0 %vm93_vm0, %v77_v3 }
  0x77   :  { %1756 = vmatprep.mubr.msk.f32.mxu0 %vm93_vm0, %v78_v4 }
  0x7a   :  { %1757 = vmatmul.mubr.msk.f32.gmra.mxu0 %vm93_vm0, %v79_v5 }
  0x7b   :  { %1759 = vmatprep.mubr.msk.f32.mxu0 %vm93_vm0, %v80_v6 }
  0x7e   :  { %1760 = vmatmul.mubr.msk.f32.gmra.mxu0 %vm93_vm0, %v81_v7 }
  0x7f   :  { %1762 = vmatprep.mubr.msk.f32.mxu0 %vm93_vm0, %v82_v8 }
  0x82   :  { %1763 = vmatmul.mubr.msk.f32.gmra.mxu0 %vm93_vm0, %v83_v9 }
  0xc6   :  { %v1671_v11 = vpop.f32.mrf.mxu0 }
  0xc7   :  { %v358_v12 = vadd.f32 %v1671_v11, %v2212_v10 }
  0xc8   :  { %v352_v13 = vpop.f32.mrf.mxu0 }
  0xc9   :  { %v353_v14 = vadd.f32 %v2212_v10, %v352_v13  ;;  %v672_v17 = vmax.f32 %v358_v12, 0.0 }
  0xca   :  { %v1674_v15 = vpop.f32.mrf.mxu0 }
  0xcb   :  { %v671_v16 = vmax.f32 %v353_v14, 0.0  ;;  %v368_v18 = vadd.f32 %v1674_v15, %v2212_v10 }
  0xcc   :  { %v362_v19 = vpop.f32.mrf.mxu0 }
  0xcd   :  { %v363_v20 = vadd.f32 %v2212_v10, %v362_v19  ;;  %1781 = vmatprep.mubr.msk.f32.mxu0 %vm750_vm1, %v671_v16  ;;  %v674_v23 = vmax.f32 %v368_v18, 0.0 }
  0xce   :  { %v1677_v21 = vpop.f32.mrf.mxu0  ;;  %1782 = vmatmul.mubr.msk.f32.vlgmr.msra.gmra.mxu0 %vm750_vm1, %v672_v17 }
  0xcf   :  { %v673_v22 = vmax.f32 %v363_v20, 0.0  ;;  %v378_v24 = vadd.f32 %v1677_v21, %v2212_v10 }
  0xd0   :  { %v372_v25 = vpop.f32.mrf.mxu0 }
  0xd1   :  { %v373_v26 = vadd.f32 %v2212_v10, %v372_v25  ;;  %1784 = vmatprep.mubr.msk.f32.mxu1 %vm750_vm1, %v673_v22  ;;  %v676_v29 = vmax.f32 %v378_v24, 0.0 }
  0xd2   :  { %v1680_v27 = vpop.f32.mrf.mxu0  ;;  %1785 = vmatmul.mubr.msk.f32.vlgmr.msra.gmra.mxu1 %vm750_vm1, %v674_v23 }
  0xd3   :  { %v675_v28 = vmax.f32 %v373_v26, 0.0  ;;  %v388_v30 = vadd.f32 %v1680_v27, %v2212_v10 }
  0xd4   :  { %v382_v31 = vpop.f32.mrf.mxu0 }
  0xd5   :  { %v383_v32 = vadd.f32 %v2212_v10, %v382_v31  ;;  %1787 = vmatprep.mubr.msk.f32.mxu1 %vm750_vm1, %v675_v28  ;;  %v678_v35 = vmax.f32 %v388_v30, 0.0 }
  0xd6   :  { %v1683_v33 = vpop.f32.mrf.mxu0  ;;  %1788 = vmatmul.mubr.msk.f32.gmra.mxu1 %vm750_vm1, %v676_v29 }
  0xd7   :  { %v677_v34 = vmax.f32 %v383_v32, 0.0  ;;  %v398_v36 = vadd.f32 %v1683_v33, %v2212_v10 }
  0xd8   :  { %v392_v37 = vpop.f32.mrf.mxu0 }
  0xd9   :  { %v393_v38 = vadd.f32 %v2212_v10, %v392_v37  ;;  %1790 = vmatprep.mubr.msk.f32.mxu1 %vm750_vm1, %v677_v34  ;;  %v680_v41 = vmax.f32 %v398_v36, 0.0 }
  0xda   :  { %v1686_v39 = vpop.f32.mrf.mxu0  ;;  %1791 = vmatmul.mubr.msk.f32.gmra.mxu1 %vm750_vm1, %v678_v35 }
  0xdb   :  { %v679_v40 = vmax.f32 %v393_v38, 0.0  ;;  %v408_v42 = vadd.f32 %v1686_v39, %v2212_v10 }
  0xdc   :  { %v402_v43 = vpop.f32.mrf.mxu0 }
  0xdd   :  { %v403_v44 = vadd.f32 %v2212_v10, %v402_v43  ;;  %1793 = vmatprep.mubr.msk.f32.mxu1 %vm750_vm1, %v679_v40  ;;  %v682_v47 = vmax.f32 %v408_v42, 0.0 }
  0xde   :  { %v1689_v45 = vpop.f32.mrf.mxu0  ;;  %1794 = vmatmul.mubr.msk.f32.gmra.mxu1 %vm750_vm1, %v680_v41 }
  0xdf   :  { %v681_v46 = vmax.f32 %v403_v44, 0.0  ;;  %v418_v48 = vadd.f32 %v1689_v45, %v2212_v10 }
  0xe0   :  { %v412_v49 = vpop.f32.mrf.mxu0 }
  0xe1   :  { %v413_v50 = vadd.f32 %v2212_v10, %v412_v49  ;;  %1796 = vmatprep.mubr.msk.f32.mxu1 %vm750_vm1, %v681_v46  ;;  %v684_v53 = vmax.f32 %v418_v48, 0.0 }
  0xe2   :  { %v1692_v51 = vpop.f32.mrf.mxu0  ;;  %1797 = vmatmul.mubr.msk.f32.gmra.mxu1 %vm750_vm1, %v682_v47 }
  0xe3   :  { %v683_v52 = vmax.f32 %v413_v50, 0.0  ;;  %v428_v54 = vadd.f32 %v1692_v51, %v2212_v10 }
  0xe4   :  { %v422_v55 = vpop.f32.mrf.mxu0 }
  0xe5   :  { %v423_v56 = vadd.f32 %v2212_v10, %v422_v55  ;;  %1799 = vmatprep.mubr.msk.f32.mxu1 %vm750_vm1, %v683_v52  ;;  %v686_v59 = vmax.f32 %v428_v54, 0.0 }
  0xe6   :  { %v1695_v57 = vpop.f32.mrf.mxu0  ;;  %1800 = vmatmul.mubr.msk.f32.gmra.mxu1 %vm750_vm1, %v684_v53 }
  0xe7   :  { %v685_v58 = vmax.f32 %v423_v56, 0.0  ;;  %v438_v60 = vadd.f32 %v1695_v57, %v2212_v10 }
  0xe8   :  { %v432_v61 = vpop.f32.mrf.mxu0 }
  0xe9   :  { %v433_v62 = vadd.f32 %v2212_v10, %v432_v61  ;;  %1802 = vmatprep.mubr.msk.f32.mxu1 %vm750_vm1, %v685_v58  ;;  %v688_v1 = vmax.f32 %v438_v60, 0.0 }
  0xea   :  { %v1698_v63 = vpop.f32.mrf.mxu0  ;;  %1803 = vmatmul.mubr.msk.f32.gmra.mxu1 %vm750_vm1, %v686_v59 }
  0xeb   :  { %v687_v0 = vmax.f32 %v433_v62, 0.0  ;;  %v448_v2 = vadd.f32 %v1698_v63, %v2212_v10 }
  0xec   :  { %v442_v3 = vpop.f32.mrf.mxu0 }
  0xed   :  { %v443_v4 = vadd.f32 %v2212_v10, %v442_v3  ;;  %1805 = vmatprep.mubr.msk.f32.mxu1 %vm750_vm1, %v687_v0  ;;  %v690_v7 = vmax.f32 %v448_v2, 0.0 }
  0xee   :  { %v1701_v5 = vpop.f32.mrf.mxu0  ;;  %1806 = vmatmul.mubr.msk.f32.gmra.mxu1 %vm750_vm1, %v688_v1 }
  0xef   :  { %v689_v6 = vmax.f32 %v443_v4, 0.0  ;;  %v458_v8 = vadd.f32 %v1701_v5, %v2212_v10 }
  0xf0   :  { %v452_v9 = vpop.f32.mrf.mxu0 }
  0xf1   :  { %v453_v11 = vadd.f32 %v2212_v10, %v452_v9  ;;  %1808 = vmatprep.mubr.msk.f32.mxu1 %vm750_vm1, %v689_v6  ;;  %v692_v14 = vmax.f32 %v458_v8, 0.0 }
  0xf2   :  { %v1704_v12 = vpop.f32.mrf.mxu0  ;;  %1809 = vmatmul.mubr.msk.f32.gmra.mxu1 %vm750_vm1, %v690_v7 }
  0xf3   :  { %v691_v13 = vmax.f32 %v453_v11, 0.0  ;;  %v468_v15 = vadd.f32 %v1704_v12, %v2212_v10 }
  0xf4   :  { %v462_v16 = vpop.f32.mrf.mxu0 }
  0xf5   :  { %v463_v17 = vadd.f32 %v2212_v10, %v462_v16  ;;  %1811 = vmatprep.mubr.msk.f32.mxu1 %vm750_vm1, %v691_v13  ;;  %v694_v20 = vmax.f32 %v468_v15, 0.0 }
  0xf6   :  { %v1707_v18 = vpop.f32.mrf.mxu0  ;;  %1812 = vmatmul.mubr.msk.f32.gmra.mxu1 %vm750_vm1, %v692_v14 }
  0xf7   :  { %v693_v19 = vmax.f32 %v463_v17, 0.0  ;;  %v478_v21 = vadd.f32 %v1707_v18, %v2212_v10 }
  0xf8   :  { %v472_v22 = vpop.f32.mrf.mxu0 }
  0xf9   :  { %v473_v23 = vadd.f32 %v2212_v10, %v472_v22  ;;  %1814 = vmatprep.mubr.msk.f32.mxu1 %vm750_vm1, %v693_v19  ;;  %v696_v26 = vmax.f32 %v478_v21, 0.0 }
  0xfa   :  { %v1710_v24 = vpop.f32.mrf.mxu0  ;;  %1815 = vmatmul.mubr.msk.f32.gmra.mxu1 %vm750_vm1, %v694_v20 }
  0xfb   :  { %v695_v25 = vmax.f32 %v473_v23, 0.0  ;;  %v488_v27 = vadd.f32 %v1710_v24, %v2212_v10 }
  0xfc   :  { %v482_v28 = vpop.f32.mrf.mxu0 }
  0xfd   :  { %v483_v29 = vadd.f32 %v2212_v10, %v482_v28  ;;  %1817 = vmatprep.mubr.msk.f32.mxu1 %vm750_vm1, %v695_v25  ;;  %v698_v32 = vmax.f32 %v488_v27, 0.0 }
  0xfe   :  { %v1713_v30 = vpop.f32.mrf.mxu0  ;;  %1818 = vmatmul.mubr.msk.f32.gmra.mxu1 %vm750_vm1, %v696_v26 }
  0xff   :  { %v697_v31 = vmax.f32 %v483_v29, 0.0  ;;  %v498_v33 = vadd.f32 %v1713_v30, %v2212_v10 }
 0x100   :  { %v492_v34 = vpop.f32.mrf.mxu0 }
 0x101   :  { %v493_v35 = vadd.f32 %v2212_v10, %v492_v34  ;;  %1820 = vmatprep.mubr.msk.f32.mxu1 %vm750_vm1, %v697_v31  ;;  %v700_v38 = vmax.f32 %v498_v33, 0.0 }
 0x102   :  { %v1716_v36 = vpop.f32.mrf.mxu0  ;;  %1821 = vmatmul.mubr.msk.f32.gmra.mxu1 %vm750_vm1, %v698_v32 }
 0x103   :  { %v699_v37 = vmax.f32 %v493_v35, 0.0  ;;  %v508_v39 = vadd.f32 %v1716_v36, %v2212_v10 }
 0x104   :  { %v502_v40 = vpop.f32.mrf.mxu0 }
 0x105   :  { %v503_v41 = vadd.f32 %v2212_v10, %v502_v40  ;;  %1823 = vmatprep.mubr.msk.f32.mxu1 %vm750_vm1, %v699_v37  ;;  %v702_v44 = vmax.f32 %v508_v39, 0.0 }
 0x106   :  { %v1719_v42 = vpop.f32.mrf.mxu0  ;;  %1824 = vmatmul.mubr.msk.f32.gmra.mxu1 %vm750_vm1, %v700_v38 }
 0x107   :  { %v701_v43 = vmax.f32 %v503_v41, 0.0  ;;  %v518_v45 = vadd.f32 %v1719_v42, %v2212_v10 }
 0x108   :  { %v512_v46 = vpop.f32.mrf.mxu0 }
 0x109   :  { %v513_v47 = vadd.f32 %v2212_v10, %v512_v46  ;;  %1826 = vmatprep.mubr.msk.f32.mxu1 %vm750_vm1, %v701_v43  ;;  %v704_v50 = vmax.f32 %v518_v45, 0.0 }
 0x10a   :  { %v1722_v48 = vpop.f32.mrf.mxu0  ;;  %1827 = vmatmul.mubr.msk.f32.gmra.mxu1 %vm750_vm1, %v702_v44 }
 0x10b   :  { %v703_v49 = vmax.f32 %v513_v47, 0.0  ;;  %v528_v51 = vadd.f32 %v1722_v48, %v2212_v10 }
 0x10c   :  { %v522_v52 = vpop.f32.mrf.mxu0 }
 0x10d   :  { %v523_v53 = vadd.f32 %v2212_v10, %v522_v52  ;;  %1829 = vmatprep.mubr.msk.f32.mxu1 %vm750_vm1, %v703_v49  ;;  %v706_v56 = vmax.f32 %v528_v51, 0.0 }
 0x10e   :  { %v1725_v54 = vpop.f32.mrf.mxu0  ;;  %1830 = vmatmul.mubr.msk.f32.gmra.mxu1 %vm750_vm1, %v704_v50 }
 0x10f   :  { %v705_v55 = vmax.f32 %v523_v53, 0.0  ;;  %v538_v57 = vadd.f32 %v1725_v54, %v2212_v10 }
 0x110   :  { %v532_v58 = vpop.f32.mrf.mxu0 }
 0x111   :  { %v533_v59 = vadd.f32 %v2212_v10, %v532_v58  ;;  %1832 = vmatprep.mubr.msk.f32.mxu1 %vm750_vm1, %v705_v55  ;;  %v708_v62 = vmax.f32 %v538_v57, 0.0 }
 0x112   :  { %v1728_v60 = vpop.f32.mrf.mxu0  ;;  %1833 = vmatmul.mubr.msk.f32.gmra.mxu1 %vm750_vm1, %v706_v56 }
 0x113   :  { %v707_v61 = vmax.f32 %v533_v59, 0.0  ;;  %v548_v63 = vadd.f32 %v1728_v60, %v2212_v10 }
 0x114   :  { %v542_v0 = vpop.f32.mrf.mxu0 }
 0x115   :  { %v543_v1 = vadd.f32 %v2212_v10, %v542_v0  ;;  %1835 = vmatprep.mubr.msk.f32.mxu1 %vm750_vm1, %v707_v61  ;;  %v710_v4 = vmax.f32 %v548_v63, 0.0 }
 0x116   :  { %v1731_v2 = vpop.f32.mrf.mxu0  ;;  %1836 = vmatmul.mubr.msk.f32.gmra.mxu1 %vm750_vm1, %v708_v62 }
 0x117   :  { %v709_v3 = vmax.f32 %v543_v1, 0.0  ;;  %v558_v5 = vadd.f32 %v1731_v2, %v2212_v10 }
 0x118   :  { %v552_v6 = vpop.f32.mrf.mxu0 }
 0x119   :  { %v553_v7 = vadd.f32 %v2212_v10, %v552_v6  ;;  %1838 = vmatprep.mubr.msk.f32.mxu1 %vm750_vm1, %v709_v3  ;;  %v712_v11 = vmax.f32 %v558_v5, 0.0 }
 0x11a   :  { %v1734_v8 = vpop.f32.mrf.mxu0  ;;  %1839 = vmatmul.mubr.msk.f32.gmra.mxu1 %vm750_vm1, %v710_v4 }
 0x11b   :  { %v711_v9 = vmax.f32 %v553_v7, 0.0  ;;  %v568_v12 = vadd.f32 %v1734_v8, %v2212_v10 }
 0x11c   :  { %v562_v13 = vpop.f32.mrf.mxu0 }
 0x11d   :  { %v563_v14 = vadd.f32 %v2212_v10, %v562_v13  ;;  %1841 = vmatprep.mubr.msk.f32.mxu1 %vm750_vm1, %v711_v9  ;;  %v714_v17 = vmax.f32 %v568_v12, 0.0 }
 0x11e   :  { %v1737_v15 = vpop.f32.mrf.mxu0  ;;  %1842 = vmatmul.mubr.msk.f32.gmra.mxu1 %vm750_vm1, %v712_v11 }
 0x11f   :  { %v713_v16 = vmax.f32 %v563_v14, 0.0  ;;  %v578_v18 = vadd.f32 %v1737_v15, %v2212_v10  ;;  %v2345_v14 = vld [vmem:[%s2671_s4] ss:$0 sm:$0xff] }
 0x120   :  { %v572_v19 = vpop.f32.mrf.mxu0 }
 0x121   :  { %v573_v20 = vadd.f32 %v2212_v10, %v572_v19  ;;  %1844 = vmatprep.mubr.msk.f32.mxu1 %vm750_vm1, %v713_v16  ;;  %v716_v23 = vmax.f32 %v578_v18, 0.0 }
 0x122   :  { %v1740_v21 = vpop.f32.mrf.mxu0  ;;  %1845 = vmatmul.mubr.msk.f32.gmra.mxu1 %vm750_vm1, %v714_v17 }
 0x123   :  { %v715_v22 = vmax.f32 %v573_v20, 0.0  ;;  %v588_v24 = vadd.f32 %v1740_v21, %v2212_v10 }
 0x124   :  { %v582_v25 = vpop.f32.mrf.mxu0 }
 0x125   :  { %v583_v26 = vadd.f32 %v2212_v10, %v582_v25  ;;  %1847 = vmatprep.mubr.msk.f32.mxu1 %vm750_vm1, %v715_v22  ;;  %v718_v29 = vmax.f32 %v588_v24, 0.0 }
 0x126   :  { %v1743_v27 = vpop.f32.mrf.mxu0  ;;  %1848 = vmatmul.mubr.msk.f32.gmra.mxu1 %vm750_vm1, %v716_v23 }
 0x127   :  { %v717_v28 = vmax.f32 %v583_v26, 0.0  ;;  %v598_v30 = vadd.f32 %v1743_v27, %v2212_v10 }
 0x128   :  { %v592_v31 = vpop.f32.mrf.mxu0 }
 0x129   :  { %v593_v32 = vadd.f32 %v2212_v10, %v592_v31  ;;  %1850 = vmatprep.mubr.msk.f32.mxu1 %vm750_vm1, %v717_v28  ;;  %v720_v35 = vmax.f32 %v598_v30, 0.0 }
 0x12a   :  { %v1746_v33 = vpop.f32.mrf.mxu0  ;;  %1851 = vmatmul.mubr.msk.f32.gmra.mxu1 %vm750_vm1, %v718_v29 }
 0x12b   :  { %v719_v34 = vmax.f32 %v593_v32, 0.0  ;;  %v608_v36 = vadd.f32 %v1746_v33, %v2212_v10 }
 0x12c   :  { %v602_v37 = vpop.f32.mrf.mxu0 }
 0x12d   :  { %v603_v38 = vadd.f32 %v2212_v10, %v602_v37  ;;  %1853 = vmatprep.mubr.msk.f32.mxu1 %vm750_vm1, %v719_v34  ;;  %v722_v41 = vmax.f32 %v608_v36, 0.0 }
 0x12e   :  { %v1749_v39 = vpop.f32.mrf.mxu0  ;;  %1854 = vmatmul.mubr.msk.f32.gmra.mxu1 %vm750_vm1, %v720_v35 }
 0x12f   :  { %v721_v40 = vmax.f32 %v603_v38, 0.0  ;;  %v618_v42 = vadd.f32 %v1749_v39, %v2212_v10 }
 0x130   :  { %v612_v43 = vpop.f32.mrf.mxu0 }
 0x131   :  { %v613_v44 = vadd.f32 %v2212_v10, %v612_v43  ;;  %1856 = vmatprep.mubr.msk.f32.mxu1 %vm750_vm1, %v721_v40  ;;  %v724_v47 = vmax.f32 %v618_v42, 0.0 }
 0x132   :  { %v1752_v45 = vpop.f32.mrf.mxu0  ;;  %1857 = vmatmul.mubr.msk.f32.gmra.mxu1 %vm750_vm1, %v722_v41 }
 0x133   :  { %v723_v46 = vmax.f32 %v613_v44, 0.0  ;;  %v628_v48 = vadd.f32 %v1752_v45, %v2212_v10 }
 0x134   :  { %v622_v49 = vpop.f32.mrf.mxu0 }
 0x135   :  { %v623_v50 = vadd.f32 %v2212_v10, %v622_v49  ;;  %1859 = vmatprep.mubr.msk.f32.mxu1 %vm750_vm1, %v723_v46  ;;  %v726_v53 = vmax.f32 %v628_v48, 0.0 }
 0x136   :  { %v1755_v51 = vpop.f32.mrf.mxu0  ;;  %1860 = vmatmul.mubr.msk.f32.gmra.mxu1 %vm750_vm1, %v724_v47 }
 0x137   :  { %v725_v52 = vmax.f32 %v623_v50, 0.0  ;;  %v638_v54 = vadd.f32 %v1755_v51, %v2212_v10 }
 0x138   :  { %v632_v55 = vpop.f32.mrf.mxu0 }
 0x139   :  { %v633_v56 = vadd.f32 %v2212_v10, %v632_v55  ;;  %1862 = vmatprep.mubr.msk.f32.mxu1 %vm750_vm1, %v725_v52  ;;  %v728_v59 = vmax.f32 %v638_v54, 0.0 }
 0x13a   :  { %v1758_v57 = vpop.f32.mrf.mxu0  ;;  %1863 = vmatmul.mubr.msk.f32.gmra.mxu1 %vm750_vm1, %v726_v53 }
 0x13b   :  { %v727_v58 = vmax.f32 %v633_v56, 0.0  ;;  %v648_v60 = vadd.f32 %v1758_v57, %v2212_v10 }
 0x13c   :  { %v642_v61 = vpop.f32.mrf.mxu0 }
 0x13d   :  { %v643_v62 = vadd.f32 %v2212_v10, %v642_v61  ;;  %1865 = vmatprep.mubr.msk.f32.mxu1 %vm750_vm1, %v727_v58  ;;  %v730_v1 = vmax.f32 %v648_v60, 0.0 }
 0x13e   :  { %v1761_v63 = vpop.f32.mrf.mxu0  ;;  %1866 = vmatmul.mubr.msk.f32.gmra.mxu1 %vm750_vm1, %v728_v59 }
 0x13f   :  { %v729_v0 = vmax.f32 %v643_v62, 0.0  ;;  %v658_v2 = vadd.f32 %v1761_v63, %v2212_v10 }
 0x140   :  { %v652_v3 = vpop.f32.mrf.mxu0 }
 0x141   :  { %v653_v4 = vadd.f32 %v2212_v10, %v652_v3  ;;  %1868 = vmatprep.mubr.msk.f32.mxu1 %vm750_vm1, %v729_v0  ;;  %v732_v7 = vmax.f32 %v658_v2, 0.0 }
 0x142   :  { %v1764_v5 = vpop.f32.mrf.mxu0  ;;  %1869 = vmatmul.mubr.msk.f32.gmra.mxu1 %vm750_vm1, %v730_v1 }
 0x143   :  { %v731_v6 = vmax.f32 %v653_v4, 0.0  ;;  %v668_v8 = vadd.f32 %v1764_v5, %v2212_v10 }
 0x144   :  { %v662_v9 = vpop.f32.mrf.mxu0 }
 0x145   :  { %v663_v11 = vadd.f32 %v2212_v10, %v662_v9  ;;  %1871 = vmatprep.mubr.msk.f32.mxu1 %vm750_vm1, %v731_v6  ;;  %v734_v13 = vmax.f32 %v668_v8, 0.0 }
 0x146   :  { %1872 = vmatmul.mubr.msk.f32.gmra.mxu1 %vm750_vm1, %v732_v7 }
 0x147   :  { %v733_v12 = vmax.f32 %v663_v11, 0.0 }
 0x149   :  { %1874 = vmatprep.mubr.msk.f32.mxu1 %vm750_vm1, %v733_v12 }
 0x14a   :  { %1875 = vmatmul.mubr.msk.f32.gmra.mxu1 %vm750_vm1, %v734_v13 }
 0x18e   :  { %v1783_v15 = vpop.f32.mrf.mxu0 }
 0x18f   :  { %v1015_v16 = vadd.f32 %v1783_v15, %v2345_v14 }
 0x190   :  { %v1009_v10 = vpop.f32.mrf.mxu0 }
 0x191   :  { %1330 = vst.msk [vmem:[%s2672_s5 + $0x8] sm:$0xff] %vm1328_vm2, %v1015_v16  ;;  %v1010_v17 = vadd.f32 %v2345_v14, %v1009_v10 }
 0x192   :  { %v1786_v18 = vpop.f32.mrf.mxu1 }
 0x193   :  { %1329 = vst.msk [vmem:[%s2672_s5] sm:$0xff] %vm1328_vm2, %v1010_v17  ;;  %v1025_v19 = vadd.f32 %v1786_v18, %v2345_v14 }
 0x194   :  { %v1019_v20 = vpop.f32.mrf.mxu1 }
 0x195   :  { %1332 = vst.msk [vmem:[%s2672_s5 + $0x18] sm:$0xff] %vm1328_vm2, %v1025_v19  ;;  %v1020_v21 = vadd.f32 %v2345_v14, %v1019_v20 }
 0x196   :  { %v1789_v22 = vpop.f32.mrf.mxu1 }
 0x197   :  { %1331 = vst.msk [vmem:[%s2672_s5 + $0x10] sm:$0xff] %vm1328_vm2, %v1020_v21  ;;  %v1035_v23 = vadd.f32 %v1789_v22, %v2345_v14 }
 0x198   :  { %v1029_v24 = vpop.f32.mrf.mxu1 }
 0x199   :  { %1334 = vst.msk [vmem:[%s2672_s5 + $0x28] sm:$0xff] %vm1328_vm2, %v1035_v23  ;;  %v1030_v25 = vadd.f32 %v2345_v14, %v1029_v24 }
 0x19a   :  { %v1792_v26 = vpop.f32.mrf.mxu1 }
 0x19b   :  { %1333 = vst.msk [vmem:[%s2672_s5 + $0x20] sm:$0xff] %vm1328_vm2, %v1030_v25  ;;  %v1045_v27 = vadd.f32 %v1792_v26, %v2345_v14 }
 0x19c   :  { %v1039_v28 = vpop.f32.mrf.mxu1 }
 0x19d   :  { %1336 = vst.msk [vmem:[%s2672_s5 + $0x38] sm:$0xff] %vm1328_vm2, %v1045_v27  ;;  %v1040_v29 = vadd.f32 %v2345_v14, %v1039_v28 }
 0x19e   :  { %v1795_v30 = vpop.f32.mrf.mxu1 }
 0x19f   :  { %1335 = vst.msk [vmem:[%s2672_s5 + $0x30] sm:$0xff] %vm1328_vm2, %v1040_v29  ;;  %v1055_v31 = vadd.f32 %v1795_v30, %v2345_v14 }
 0x1a0   :  { %v1049_v32 = vpop.f32.mrf.mxu1 }
 0x1a1   :  { %1338 = vst.msk [vmem:[%s2672_s5 + $0x48] sm:$0xff] %vm1328_vm2, %v1055_v31  ;;  %v1050_v33 = vadd.f32 %v2345_v14, %v1049_v32 }
 0x1a2   :  { %v1798_v34 = vpop.f32.mrf.mxu1 }
 0x1a3   :  { %1337 = vst.msk [vmem:[%s2672_s5 + $0x40] sm:$0xff] %vm1328_vm2, %v1050_v33  ;;  %v1065_v35 = vadd.f32 %v1798_v34, %v2345_v14 }
 0x1a4   :  { %v1059_v36 = vpop.f32.mrf.mxu1 }
 0x1a5   :  { %1340 = vst.msk [vmem:[%s2672_s5 + $0x58] sm:$0xff] %vm1328_vm2, %v1065_v35  ;;  %v1060_v37 = vadd.f32 %v2345_v14, %v1059_v36 }
 0x1a6   :  { %v1801_v38 = vpop.f32.mrf.mxu1 }
 0x1a7   :  { %1339 = vst.msk [vmem:[%s2672_s5 + $0x50] sm:$0xff] %vm1328_vm2, %v1060_v37  ;;  %v1075_v39 = vadd.f32 %v1801_v38, %v2345_v14 }
 0x1a8   :  { %v1069_v40 = vpop.f32.mrf.mxu1 }
 0x1a9   :  { %1342 = vst.msk [vmem:[%s2672_s5 + $0x68] sm:$0xff] %vm1328_vm2, %v1075_v39  ;;  %v1070_v41 = vadd.f32 %v2345_v14, %v1069_v40 }
 0x1aa   :  { %v1804_v42 = vpop.f32.mrf.mxu1 }
 0x1ab   :  { %1341 = vst.msk [vmem:[%s2672_s5 + $0x60] sm:$0xff] %vm1328_vm2, %v1070_v41  ;;  %v1085_v43 = vadd.f32 %v1804_v42, %v2345_v14 }
 0x1ac   :  { %v1079_v44 = vpop.f32.mrf.mxu1 }
 0x1ad   :  { %1344 = vst.msk [vmem:[%s2672_s5 + $0x78] sm:$0xff] %vm1328_vm2, %v1085_v43  ;;  %v1080_v45 = vadd.f32 %v2345_v14, %v1079_v44 }
 0x1ae   :  { %v1807_v46 = vpop.f32.mrf.mxu1 }
 0x1af   :  { %1343 = vst.msk [vmem:[%s2672_s5 + $0x70] sm:$0xff] %vm1328_vm2, %v1080_v45  ;;  %v1095_v47 = vadd.f32 %v1807_v46, %v2345_v14 }
 0x1b0   :  { %v1089_v48 = vpop.f32.mrf.mxu1 }
 0x1b1   :  { %1346 = vst.msk [vmem:[%s2672_s5 + $0x88] sm:$0xff] %vm1328_vm2, %v1095_v47  ;;  %v1090_v49 = vadd.f32 %v2345_v14, %v1089_v48 }
 0x1b2   :  { %v1810_v50 = vpop.f32.mrf.mxu1 }
 0x1b3   :  { %1345 = vst.msk [vmem:[%s2672_s5 + $0x80] sm:$0xff] %vm1328_vm2, %v1090_v49  ;;  %v1105_v51 = vadd.f32 %v1810_v50, %v2345_v14 }
 0x1b4   :  { %v1099_v52 = vpop.f32.mrf.mxu1 }
 0x1b5   :  { %1348 = vst.msk [vmem:[%s2672_s5 + $0x98] sm:$0xff] %vm1328_vm2, %v1105_v51  ;;  %v1100_v53 = vadd.f32 %v2345_v14, %v1099_v52 }
 0x1b6   :  { %v1813_v54 = vpop.f32.mrf.mxu1 }
 0x1b7   :  { %1347 = vst.msk [vmem:[%s2672_s5 + $0x90] sm:$0xff] %vm1328_vm2, %v1100_v53  ;;  %v1115_v55 = vadd.f32 %v1813_v54, %v2345_v14 }
 0x1b8   :  { %v1109_v56 = vpop.f32.mrf.mxu1 }
 0x1b9   :  { %1350 = vst.msk [vmem:[%s2672_s5 + $0xa8] sm:$0xff] %vm1328_vm2, %v1115_v55  ;;  %v1110_v57 = vadd.f32 %v2345_v14, %v1109_v56 }
 0x1ba   :  { %v1816_v58 = vpop.f32.mrf.mxu1 }
 0x1bb   :  { %1349 = vst.msk [vmem:[%s2672_s5 + $0xa0] sm:$0xff] %vm1328_vm2, %v1110_v57  ;;  %v1125_v59 = vadd.f32 %v1816_v58, %v2345_v14 }
 0x1bc   :  { %v1119_v60 = vpop.f32.mrf.mxu1 }
 0x1bd   :  { %1352 = vst.msk [vmem:[%s2672_s5 + $0xb8] sm:$0xff] %vm1328_vm2, %v1125_v59  ;;  %v1120_v61 = vadd.f32 %v2345_v14, %v1119_v60 }
 0x1be   :  { %v1819_v62 = vpop.f32.mrf.mxu1 }
 0x1bf   :  { %1351 = vst.msk [vmem:[%s2672_s5 + $0xb0] sm:$0xff] %vm1328_vm2, %v1120_v61  ;;  %v1135_v63 = vadd.f32 %v1819_v62, %v2345_v14 }
 0x1c0   :  { %v1129_v0 = vpop.f32.mrf.mxu1 }
 0x1c1   :  { %1354 = vst.msk [vmem:[%s2672_s5 + $0xc8] sm:$0xff] %vm1328_vm2, %v1135_v63  ;;  %v1130_v1 = vadd.f32 %v2345_v14, %v1129_v0 }
 0x1c2   :  { %v1822_v2 = vpop.f32.mrf.mxu1 }
 0x1c3   :  { %1353 = vst.msk [vmem:[%s2672_s5 + $0xc0] sm:$0xff] %vm1328_vm2, %v1130_v1  ;;  %v1145_v3 = vadd.f32 %v1822_v2, %v2345_v14 }
 0x1c4   :  { %v1139_v4 = vpop.f32.mrf.mxu1 }
 0x1c5   :  { %1356 = vst.msk [vmem:[%s2672_s5 + $0xd8] sm:$0xff] %vm1328_vm2, %v1145_v3  ;;  %v1140_v5 = vadd.f32 %v2345_v14, %v1139_v4 }
 0x1c6   :  { %v1825_v6 = vpop.f32.mrf.mxu1 }
 0x1c7   :  { %1355 = vst.msk [vmem:[%s2672_s5 + $0xd0] sm:$0xff] %vm1328_vm2, %v1140_v5  ;;  %v1155_v7 = vadd.f32 %v1825_v6, %v2345_v14 }
 0x1c8   :  { %v1149_v8 = vpop.f32.mrf.mxu1 }
 0x1c9   :  { %1358 = vst.msk [vmem:[%s2672_s5 + $0xe8] sm:$0xff] %vm1328_vm2, %v1155_v7  ;;  %v1150_v9 = vadd.f32 %v2345_v14, %v1149_v8 }
 0x1ca   :  { %v1828_v11 = vpop.f32.mrf.mxu1 }
 0x1cb   :  { %1357 = vst.msk [vmem:[%s2672_s5 + $0xe0] sm:$0xff] %vm1328_vm2, %v1150_v9  ;;  %v1165_v12 = vadd.f32 %v1828_v11, %v2345_v14 }
 0x1cc   :  { %v1159_v13 = vpop.f32.mrf.mxu1 }
 0x1cd   :  { %1360 = vst.msk [vmem:[%s2672_s5 + $0xf8] sm:$0xff] %vm1328_vm2, %v1165_v12  ;;  %v1160_v15 = vadd.f32 %v2345_v14, %v1159_v13 }
 0x1ce   :  { %v1831_v16 = vpop.f32.mrf.mxu1 }
 0x1cf   :  { %1359 = vst.msk [vmem:[%s2672_s5 + $0xf0] sm:$0xff] %vm1328_vm2, %v1160_v15  ;;  %v1175_v10 = vadd.f32 %v1831_v16, %v2345_v14 }
 0x1d0   :  { %v1169_v17 = vpop.f32.mrf.mxu1 }
 0x1d1   :  { %1362 = vst.msk [vmem:[%s2672_s5 + $0x108] sm:$0xff] %vm1328_vm2, %v1175_v10  ;;  %v1170_v18 = vadd.f32 %v2345_v14, %v1169_v17 }
 0x1d2   :  { %v1834_v19 = vpop.f32.mrf.mxu1 }
 0x1d3   :  { %1361 = vst.msk [vmem:[%s2672_s5 + $0x100] sm:$0xff] %vm1328_vm2, %v1170_v18  ;;  %v1185_v20 = vadd.f32 %v1834_v19, %v2345_v14 }
 0x1d4   :  { %v1179_v21 = vpop.f32.mrf.mxu1 }
 0x1d5   :  { %1364 = vst.msk [vmem:[%s2672_s5 + $0x118] sm:$0xff] %vm1328_vm2, %v1185_v20  ;;  %v1180_v22 = vadd.f32 %v2345_v14, %v1179_v21 }
 0x1d6   :  { %v1837_v23 = vpop.f32.mrf.mxu1 }
 0x1d7   :  { %1363 = vst.msk [vmem:[%s2672_s5 + $0x110] sm:$0xff] %vm1328_vm2, %v1180_v22  ;;  %v1195_v24 = vadd.f32 %v1837_v23, %v2345_v14 }
 0x1d8   :  { %v1189_v25 = vpop.f32.mrf.mxu1 }
 0x1d9   :  { %1366 = vst.msk [vmem:[%s2672_s5 + $0x128] sm:$0xff] %vm1328_vm2, %v1195_v24  ;;  %v1190_v26 = vadd.f32 %v2345_v14, %v1189_v25 }
 0x1da   :  { %v1840_v27 = vpop.f32.mrf.mxu1 }
 0x1db   :  { %1365 = vst.msk [vmem:[%s2672_s5 + $0x120] sm:$0xff] %vm1328_vm2, %v1190_v26  ;;  %v1205_v28 = vadd.f32 %v1840_v27, %v2345_v14 }
 0x1dc   :  { %v1199_v29 = vpop.f32.mrf.mxu1 }
 0x1dd   :  { %1368 = vst.msk [vmem:[%s2672_s5 + $0x138] sm:$0xff] %vm1328_vm2, %v1205_v28  ;;  %v1200_v30 = vadd.f32 %v2345_v14, %v1199_v29 }
 0x1de   :  { %v1843_v31 = vpop.f32.mrf.mxu1 }
 0x1df   :  { %1367 = vst.msk [vmem:[%s2672_s5 + $0x130] sm:$0xff] %vm1328_vm2, %v1200_v30  ;;  %v1215_v32 = vadd.f32 %v1843_v31, %v2345_v14 }
 0x1e0   :  { %v1209_v33 = vpop.f32.mrf.mxu1 }
 0x1e1   :  { %1370 = vst.msk [vmem:[%s2672_s5 + $0x148] sm:$0xff] %vm1328_vm2, %v1215_v32  ;;  %v1210_v34 = vadd.f32 %v2345_v14, %v1209_v33 }
 0x1e2   :  { %v1846_v35 = vpop.f32.mrf.mxu1 }
 0x1e3   :  { %1369 = vst.msk [vmem:[%s2672_s5 + $0x140] sm:$0xff] %vm1328_vm2, %v1210_v34  ;;  %v1225_v36 = vadd.f32 %v1846_v35, %v2345_v14 }
 0x1e4   :  { %v1219_v37 = vpop.f32.mrf.mxu1 }
 0x1e5   :  { %1372 = vst.msk [vmem:[%s2672_s5 + $0x158] sm:$0xff] %vm1328_vm2, %v1225_v36  ;;  %v1220_v38 = vadd.f32 %v2345_v14, %v1219_v37 }
 0x1e6   :  { %v1849_v39 = vpop.f32.mrf.mxu1 }
 0x1e7   :  { %1371 = vst.msk [vmem:[%s2672_s5 + $0x150] sm:$0xff] %vm1328_vm2, %v1220_v38  ;;  %v1235_v40 = vadd.f32 %v1849_v39, %v2345_v14 }
 0x1e8   :  { %v1229_v41 = vpop.f32.mrf.mxu1 }
 0x1e9   :  { %1374 = vst.msk [vmem:[%s2672_s5 + $0x168] sm:$0xff] %vm1328_vm2, %v1235_v40  ;;  %v1230_v42 = vadd.f32 %v2345_v14, %v1229_v41 }
 0x1ea   :  { %v1852_v43 = vpop.f32.mrf.mxu1 }
 0x1eb   :  { %1373 = vst.msk [vmem:[%s2672_s5 + $0x160] sm:$0xff] %vm1328_vm2, %v1230_v42  ;;  %v1245_v44 = vadd.f32 %v1852_v43, %v2345_v14 }
 0x1ec   :  { %v1239_v45 = vpop.f32.mrf.mxu1 }
 0x1ed   :  { %1376 = vst.msk [vmem:[%s2672_s5 + $0x178] sm:$0xff] %vm1328_vm2, %v1245_v44  ;;  %v1240_v46 = vadd.f32 %v2345_v14, %v1239_v45 }
 0x1ee   :  { %v1855_v47 = vpop.f32.mrf.mxu1 }
 0x1ef   :  { %1375 = vst.msk [vmem:[%s2672_s5 + $0x170] sm:$0xff] %vm1328_vm2, %v1240_v46  ;;  %v1255_v48 = vadd.f32 %v1855_v47, %v2345_v14 }
 0x1f0   :  { %v1249_v49 = vpop.f32.mrf.mxu1 }
 0x1f1   :  { %1378 = vst.msk [vmem:[%s2672_s5 + $0x188] sm:$0xff] %vm1328_vm2, %v1255_v48  ;;  %v1250_v50 = vadd.f32 %v2345_v14, %v1249_v49 }
 0x1f2   :  { %v1858_v51 = vpop.f32.mrf.mxu1 }
 0x1f3   :  { %1377 = vst.msk [vmem:[%s2672_s5 + $0x180] sm:$0xff] %vm1328_vm2, %v1250_v50  ;;  %v1265_v52 = vadd.f32 %v1858_v51, %v2345_v14 }
 0x1f4   :  { %v1259_v53 = vpop.f32.mrf.mxu1 }
 0x1f5   :  { %1380 = vst.msk [vmem:[%s2672_s5 + $0x198] sm:$0xff] %vm1328_vm2, %v1265_v52  ;;  %v1260_v54 = vadd.f32 %v2345_v14, %v1259_v53 }
 0x1f6   :  { %v1861_v55 = vpop.f32.mrf.mxu1 }
 0x1f7   :  { %1379 = vst.msk [vmem:[%s2672_s5 + $0x190] sm:$0xff] %vm1328_vm2, %v1260_v54  ;;  %v1275_v56 = vadd.f32 %v1861_v55, %v2345_v14 }
 0x1f8   :  { %v1269_v57 = vpop.f32.mrf.mxu1 }
 0x1f9   :  { %1382 = vst.msk [vmem:[%s2672_s5 + $0x1a8] sm:$0xff] %vm1328_vm2, %v1275_v56  ;;  %v1270_v58 = vadd.f32 %v2345_v14, %v1269_v57 }
 0x1fa   :  { %v1864_v59 = vpop.f32.mrf.mxu1 }
 0x1fb   :  { %1381 = vst.msk [vmem:[%s2672_s5 + $0x1a0] sm:$0xff] %vm1328_vm2, %v1270_v58  ;;  %v1285_v60 = vadd.f32 %v1864_v59, %v2345_v14 }
 0x1fc   :  { %v1279_v61 = vpop.f32.mrf.mxu1 }
 0x1fd   :  { %1384 = vst.msk [vmem:[%s2672_s5 + $0x1b8] sm:$0xff] %vm1328_vm2, %v1285_v60  ;;  %v1280_v62 = vadd.f32 %v2345_v14, %v1279_v61 }
 0x1fe   :  { %v1867_v63 = vpop.f32.mrf.mxu1 }
 0x1ff   :  { %1383 = vst.msk [vmem:[%s2672_s5 + $0x1b0] sm:$0xff] %vm1328_vm2, %v1280_v62  ;;  %v1295_v0 = vadd.f32 %v1867_v63, %v2345_v14 }
 0x200   :  { %v1289_v1 = vpop.f32.mrf.mxu1 }
 0x201   :  { %1386 = vst.msk [vmem:[%s2672_s5 + $0x1c8] sm:$0xff] %vm1328_vm2, %v1295_v0  ;;  %v1290_v2 = vadd.f32 %v2345_v14, %v1289_v1 }
 0x202   :  { %v1870_v3 = vpop.f32.mrf.mxu1 }
 0x203   :  { %1385 = vst.msk [vmem:[%s2672_s5 + $0x1c0] sm:$0xff] %vm1328_vm2, %v1290_v2  ;;  %v1305_v4 = vadd.f32 %v1870_v3, %v2345_v14 }
 0x204   :  { %v1299_v5 = vpop.f32.mrf.mxu1 }
 0x205   :  { %1388 = vst.msk [vmem:[%s2672_s5 + $0x1d8] sm:$0xff] %vm1328_vm2, %v1305_v4  ;;  %v1300_v6 = vadd.f32 %v2345_v14, %v1299_v5 }
 0x206   :  { %v1873_v7 = vpop.f32.mrf.mxu1 }
 0x207   :  { %1387 = vst.msk [vmem:[%s2672_s5 + $0x1d0] sm:$0xff] %vm1328_vm2, %v1300_v6  ;;  %v1315_v8 = vadd.f32 %v1873_v7, %v2345_v14 }
 0x208   :  { %v1309_v9 = vpop.f32.mrf.mxu1 }
 0x209   :  { %1390 = vst.msk [vmem:[%s2672_s5 + $0x1e8] sm:$0xff] %vm1328_vm2, %v1315_v8  ;;  %v1310_v11 = vadd.f32 %v2345_v14, %v1309_v9 }
 0x20a   :  { %v1876_v12 = vpop.f32.mrf.mxu1 }
 0x20b   :  { %1389 = vst.msk [vmem:[%s2672_s5 + $0x1e0] sm:$0xff] %vm1328_vm2, %v1310_v11  ;;  %v1325_v13 = vadd.f32 %v1876_v12, %v2345_v14 }
 0x20c   :  { %v1319_v15 = vpop.f32.mrf.mxu1 }
 0x20d   :  { %1392 = vst.msk [vmem:[%s2672_s5 + $0x1f8] sm:$0xff] %vm1328_vm2, %v1325_v13  ;;  %v1320_v16 = vadd.f32 %v2345_v14, %v1319_v15 }
 0x20f   :  { %1391 = vst.msk [vmem:[%s2672_s5 + $0x1f0] sm:$0xff] %vm1328_vm2, %v1320_v16 }

</bundles_post_ra>
